<compile_context>
chip_gen: v5e
topology: v5e:2x2
jax: 0.10.0
libtpu: 0.0.40
codegen_flags: <defaults>
</compile_context>

<pallas_src>
import functools

import jax
import jax.numpy as jnp
from jax.experimental import pallas as pl
from jax.experimental.pallas import tpu as pltpu


_TM_CAP = 2048   # max rows per tile


def _round_up(a, b):
    return (a + b - 1) // b * b


def _cdiv(a, b):
    return (a + b - 1) // b


def _vmem_capacity_bytes():
    """Best-effort VMEM capacity query; conservative (v7x-sized) fallback."""
    try:
        info = pltpu.get_tpu_info()
        cap = getattr(info, "vmem_capacity_bytes", None)
        if cap:
            return int(cap)
    except Exception:
        pass
    return 64 * 1024 * 1024


def _pool_kernel(x_ref, o_ref, acc_ref, *, is_max, init_val, inv_n,
                 n_total, tn, mask_tail):
    k = pl.program_id(1)

    @pl.when(k == 0)
    def _init():
        acc_ref[...] = jnp.full(acc_ref.shape, init_val, dtype=acc_ref.dtype)

    x = x_ref[...]
    if not is_max:
        x = x.astype(jnp.float32)        # f32 accumulation only for avg

    if mask_tail:
        # Last k block overruns N; neutralize the garbage tail lanes with the
        # reduction's identity element (-inf / int-min for max, 0 for avg).
        lane = jax.lax.broadcasted_iota(jnp.int32, x.shape, dimension=1)
        x = jnp.where(lane < (n_total - k * tn), x, init_val)

    if is_max:
        acc_ref[...] = jnp.maximum(acc_ref[...],
                                   jnp.max(x, axis=-1, keepdims=True))
    else:
        acc_ref[...] = acc_ref[...] + jnp.sum(x, axis=-1, keepdims=True)

    @pl.when(k == pl.num_programs(1) - 1)
    def _finalize():
        r = acc_ref[...]
        if not is_max:
            r = r * jnp.float32(inv_n)   # precomputed 1/N, no per-tile divide
        o_ref[...] = r.astype(o_ref.dtype)


def pooling(x, pool_type="max", *, _buf_bytes=None):
    """Equivalent of Pooling(pool_type).forward(x) for x of shape (B, C, N)."""
    if pool_type == "max":
        is_max = True
    elif pool_type in ("avg", "average"):
        is_max = False
    else:
        raise ValueError(f"unknown pool_type {pool_type!r}")

    B, C, N = x.shape
    rows = B * C
    x2 = x.reshape(rows, N)              # metadata-only reshape
    dtype = x.dtype
    itemsize = jnp.dtype(dtype).itemsize

    # ---- Generation-aware VMEM budget.
    vmem_cap = _vmem_capacity_bytes()
    if vmem_cap >= 128 * 1024 * 1024:    # v5e / v6e: 128 MiB physical
        buf_bytes = 16 * 1024 * 1024
        vmem_limit = 64 * 1024 * 1024
    else:                                # v7x (64 MiB) or unknown
        buf_bytes = 8 * 1024 * 1024
        vmem_limit = 32 * 1024 * 1024
    if _buf_bytes is not None:           # test hook to exercise N tiling
        buf_bytes = _buf_bytes

    # ---- Reduction (N) tiling: keep full N if >=128 rows still fit a buffer.
    max_full_n = max(128, (buf_bytes // (128 * itemsize)) // 128 * 128)
    if N <= max_full_n:
        tn, nk = N, 1
    else:
        nk = _cdiv(N, max_full_n)
        tn = _round_up(_cdiv(N, nk), 128)
        nk = _cdiv(N, tn)

    # ---- Row tiling: balanced tiles sized against the pipeline buffer.
    tm_budget = min(_TM_CAP, max(8, (buf_bytes // (tn * itemsize)) // 8 * 8))
    if rows <= tm_budget:
        tm, ni = rows, 1                 # single full-extent row block
    else:
        ni = _cdiv(rows, tm_budget)
        if ni > 1 and ni % 2 == 1:       # even tile count -> balanced megacore
            ni_even = ni + 1
            tm_even = _round_up(_cdiv(rows, ni_even), 8)
            if _cdiv(rows, tm_even) == ni_even:
                ni = ni_even
        tm = _round_up(_cdiv(rows, ni), 8)
        ni = _cdiv(rows, tm)

    # ---- Reduction identity / accumulator dtype.
    if is_max:
        acc_dtype = dtype                # max is exact in the native dtype
        if jnp.issubdtype(dtype, jnp.floating):
            init_val = -jnp.inf
        else:
            init_val = int(jnp.iinfo(dtype).min)
    else:
        acc_dtype = jnp.float32
        init_val = 0.0

    kernel = functools.partial(
        _pool_kernel,
        is_max=is_max,
        init_val=init_val,
        inv_n=1.0 / N,
        n_total=N,
        tn=tn,
        mask_tail=(N % tn != 0),
    )

    out = pl.pallas_call(
        kernel,
        out_shape=jax.ShapeDtypeStruct((rows, 1), dtype),
        grid=(ni, nk),                                   # reduction axis last
        in_specs=[pl.BlockSpec((tm, tn), lambda i, k: (i, k))],
        out_specs=pl.BlockSpec((tm, 1), lambda i, k: (i, 0)),
        scratch_shapes=[pltpu.VMEM((tm, 1), acc_dtype)],
        compiler_params=pltpu.CompilerParams(
            dimension_semantics=("parallel", "arbitrary"),
            vmem_limit_bytes=vmem_limit,
        ),
    )(x2)

    return out[:, 0].reshape(B, C)


if __name__ == "__main__":
    key = jax.random.PRNGKey(0)

    # Small, module-consistent shapes: (batch, channels, points).
    B, C, N = 2, 8, 128
    x = jax.random.normal(key, (B, C, N), dtype=jnp.float32)

    # max pooling (module default)
    out_max = jax.block_until_ready(pooling(x, "max"))
    assert out_max.shape == (B, C)
    assert jnp.allclose(out_max, jnp.max(x, axis=2), atol=1e-6), "max mismatch"

    # avg pooling
    out_avg = jax.block_until_ready(pooling(x, "avg"))
    assert out_avg.shape == (B, C)
    assert jnp.allclose(out_avg, jnp.mean(x, axis=2), atol=1e-5), "avg mismatch"

    # Ragged rows + ragged N with in-kernel tail masking (small buffer
    # override forces the N-tiled path without large test data).
    x_odd = jax.random.normal(jax.random.PRNGKey(1), (3, 5, 300), dtype=jnp.float32)
    out_odd = jax.block_until_ready(pooling(x_odd, "max", _buf_bytes=64 * 1024))
    assert jnp.allclose(out_odd, jnp.max(x_odd, axis=2), atol=1e-6), "ragged max mismatch"
    out_odd_avg = jax.block_until_ready(pooling(x_odd, "avg", _buf_bytes=64 * 1024))
    assert jnp.allclose(out_odd_avg, jnp.mean(x_odd, axis=2), atol=1e-5), "ragged avg mismatch"

    # bf16 max stays in the native dtype (exact).
    x_bf = x.astype(jnp.bfloat16)
    out_bf = jax.block_until_ready(pooling(x_bf, "max"))
    assert jnp.array_equal(out_bf, jnp.max(x_bf, axis=2)), "bf16 max mismatch"

    # int32 max uses a native integer accumulator (exact).
    x_i = jax.random.randint(jax.random.PRNGKey(2), (2, 4, 37), -10**6, 10**6, dtype=jnp.int32)
    out_i = jax.block_until_ready(pooling(x_i, "max"))
    assert jnp.array_equal(out_i, jnp.max(x_i, axis=2)), "int32 max mismatch"

    print("KERNEL_OK")
</pallas_src>

<mosaic_0001>
module attributes {stable_mosaic.version = 11 : i64} {
  func.func @_pool_kernel(%arg0: i32, %arg1: i32, %arg2: memref<16x128xf32, #tpu.memory_space<vmem>>, %arg3: memref<16x1xf32, #tpu.memory_space<vmem>>, %arg4: memref<16x1xf32, #tpu.memory_space<vmem>>) attributes {dimension_semantics = [#tpu.dimension_semantics<parallel>, #tpu.dimension_semantics<arbitrary>], iteration_bounds = array<i64: 1, 1>, scalar_prefetch = 0 : i64, scratch_operands = 1 : i64, tpu.core_type = #tpu.core_type<tc>, window_params = [{transform_indices = @transform_0, window_bounds = array<i64: 16, 128>}, {transform_indices = @transform_1, window_bounds = array<i64: 16, 1>}]} {
    %c0_i32 = arith.constant 0 : i32
    %0 = arith.cmpi eq, %arg1, %c0_i32 : i32
    %1 = arith.extui %0 : i1 to i32
    %c0_i32_0 = arith.constant 0 : i32
    %2 = arith.cmpi ne, %1, %c0_i32_0 : i32
    scf.if %2 {
      %cst_8 = arith.constant 0xFF800000 : f32
      %12 = vector.broadcast %cst_8 : f32 to vector<16x1xf32>
      %c0_9 = arith.constant 0 : index
      %c0_10 = arith.constant 0 : index
      %13 = vector.load %arg4[%c0_9, %c0_10] : memref<16x1xf32, #tpu.memory_space<vmem>>, vector<16x1xf32>
      tpu.vector_store %arg4[%c0_9, %c0_10], %12 {strides = array<i32>} : memref<16x1xf32, #tpu.memory_space<vmem>>, vector<16x1xf32>,
    } else {
    }
    %c0 = arith.constant 0 : index
    %c0_1 = arith.constant 0 : index
    %3 = vector.load %arg2[%c0, %c0_1] : memref<16x128xf32, #tpu.memory_space<vmem>>, vector<16x128xf32>
    %c0_2 = arith.constant 0 : index
    %c0_3 = arith.constant 0 : index
    %4 = vector.load %arg4[%c0_2, %c0_3] : memref<16x1xf32, #tpu.memory_space<vmem>>, vector<16x1xf32>
    %cst = arith.constant dense<0xFF800000> : vector<16xf32>
    %5 = vector.multi_reduction <maximumf>, %3, %cst [1] : vector<16x128xf32> to vector<16xf32>
    %6 = vector.shape_cast %5 : vector<16xf32> to vector<16x1xf32>
    %7 = arith.maximumf %4, %6 : vector<16x1xf32>
    %c0_4 = arith.constant 0 : index
    %c0_5 = arith.constant 0 : index
    %8 = vector.load %arg4[%c0_4, %c0_5] : memref<16x1xf32, #tpu.memory_space<vmem>>, vector<16x1xf32>
    tpu.vector_store %arg4[%c0_4, %c0_5], %7 {strides = array<i32>} : memref<16x1xf32, #tpu.memory_space<vmem>>, vector<16x1xf32>,
    %c0_i32_6 = arith.constant 0 : i32
    %9 = arith.cmpi eq, %arg1, %c0_i32_6 : i32
    %10 = arith.extui %9 : i1 to i32
    %c0_i32_7 = arith.constant 0 : i32
    %11 = arith.cmpi ne, %10, %c0_i32_7 : i32
    scf.if %11 {
      %c0_8 = arith.constant 0 : index
      %c0_9 = arith.constant 0 : index
      %12 = vector.load %arg4[%c0_8, %c0_9] : memref<16x1xf32, #tpu.memory_space<vmem>>, vector<16x1xf32>
      %c0_10 = arith.constant 0 : index
      %c0_11 = arith.constant 0 : index
      %13 = vector.load %arg3[%c0_10, %c0_11] : memref<16x1xf32, #tpu.memory_space<vmem>>, vector<16x1xf32>
      tpu.vector_store %arg3[%c0_10, %c0_11], %12 {strides = array<i32>} : memref<16x1xf32, #tpu.memory_space<vmem>>, vector<16x1xf32>,
    } else {
    }
    return
  }
  func.func @transform_0(%arg0: i32, %arg1: i32) -> (i32, i32) {
    %c0_i32 = arith.constant 0 : i32
    return %arg0, %arg1 : i32, i32
  }
  func.func @transform_1(%arg0: i32, %arg1: i32) -> (i32, i32) {
    %c0_i32 = arith.constant 0 : i32
    %c0_i32_0 = arith.constant 0 : i32
    return %arg0, %c0_i32 : i32, i32
  }
}

</mosaic_0001>

<bundles_post_ra>
// kernel: tpu_custom_call.1
= control target key start
LH: loop header
LB: loop body
LE: loop exit
PB: predicated region body
PF: predicated region fallthrough
CT: control target
= control target key end

     0   :  { %6 = vsyncpa [#allocation4], 0  ;;  %s86_s9 = smov [#allocation3]   ;;  %s87_s11 = smov 128   ;;  %s115_s0 = inlined_call_operand.hbm [shape: f32[16,128], index: 0, kind: input, shape index: {}]   ;;  %s116_s1 = inlined_call_operand.vmem [shape: f32[16,1], index: 1, kind: output, shape index: {}]  }
   0x1   :  { %s11_s8 = sshll.u32 %s115_s0, 4  ;;  %s13_s10 = sshll.u32 %s86_s9, 4  ;;  %s12_s8 = int_to_ptr.hbm [resolvable:$true] %s11_s8  ;;  %s14_s10 = int_to_ptr.vmem [resolvable:$true] %s13_s10 }
   0x2   :  { %s88_s12 = smov 8  }
   0x3   :  { %19 = dma.hbm_to_vmem [thread:$0]  %s12_s8, 256, %s14_s10, [#allocation4], %s87_s11, %s87_s11, %s88_s12  }
   0x4   :  { %84 = dma.done.wait [#allocation4], 256  }
   0x5   :  { %85 = vsyncadd [#allocation4], 4294967040  ;;  %vm28_vm0 = vcmask 7168   ;;  %v89_v0 = vmov -inf   ;;  %v31_v1 = vld [vmem:[#allocation3] sm:$0xff]  ;;  %v32_v2 = vld [vmem:[#allocation3 + $0x8] sm:$0xff] }
   0x6   :  { %29 = vst.msk [vmem:[#allocation2] sm:$0xff] %vm28_vm0, %v89_v0  ;;  %35 = vmax.xlane.f32.xlu0 %v31_v1 }
   0x7   :  { %30 = vst.msk [vmem:[#allocation2 + $0x8] sm:$0xff] %vm28_vm0, %v89_v0 }
   0xd   :  { %v33_v3 = vld [vmem:[#allocation2] sm:$0xff] }
   0xe   :  { %37 = vmax.xlane.f32.xlu0 %v32_v2  ;;  %v34_v6 = vld [vmem:[#allocation2 + $0x8] sm:$0xff] }
  0x79   :  { %v36_v4 = vpop.xlane.xlu0 %35 }
  0x7a   :  { %v39_v5 = vmax.f32 %v33_v3, %v36_v4 }
  0x7c   :  { %42 = vst.msk [vmem:[#allocation2] sm:$0xff] %vm28_vm0, %v39_v5 }
  0x81   :  { %v38_v7 = vpop.xlane.xlu0 %37 }
  0x82   :  { %v40_v8 = vmax.f32 %v34_v6, %v38_v7 }
  0x83   :  { %v47_v9 = vld [vmem:[#allocation2] sm:$0xff] }
  0x84   :  { %49 = vst.msk [vmem:[%s116_s1] sm:$0xff] %vm28_vm0, %v47_v9 }
  0x85   :  { %43 = vst.msk [vmem:[#allocation2 + $0x8] sm:$0xff] %vm28_vm0, %v40_v8 }
  0x8c   :  { %v48_v10 = vld [vmem:[#allocation2 + $0x8] sm:$0xff] }
  0x8d   :  { %50 = vst.msk [vmem:[%s116_s1 + $0x8] sm:$0xff] %vm28_vm0, %v48_v10 }
  0x8e   :  { %55 = vsyncpa [#allocation4], 1 }

</bundles_post_ra>
